<compile_context>
chip_gen: v5e
topology: v5e:2x2
jax: 0.10.0
libtpu: 0.0.40
codegen_flags: <defaults>
</compile_context>

<pallas_src>
from functools import partial

import jax
import jax.numpy as jnp
from jax.experimental import pallas as pl
from jax.experimental.pallas import tpu as pltpu

# ----------------------------- model config ---------------------------------
NUM_CLASS = 16
EMBEDDING_DIM = 8
COV_DIM = 4
LSTM_HIDDEN_DIM = 32          # H
LSTM_LAYERS = 3               # L
BATCH = 8                     # B
X_DIM = 1 + COV_DIM           # 5  (z_{t-1} + covariates)
D_IN = X_DIM + EMBEDDING_DIM  # 13
XPAD = 8                      # x padded to 8 lanes for an aligned K=8 matmul


def _softplus(x):
    # matches torch.nn.Softplus(beta=1, threshold=20)
    return jnp.where(x > 20.0, x, jnp.log1p(jnp.exp(jnp.minimum(x, 20.0))))


# ------------------------------- kernel -------------------------------------
def deepar_step_kernel(x_ref, idx_ref, h0_ref, c0_ref, w_ref, b_ref, head_ref,
                       out_ref, hout_ref, cout_ref):
    L, B, H = h0_ref.shape
    f32 = jnp.float32

    # One-hot series id over the first H lanes (NUM_CLASS <= H); lanes >= NUM_CLASS
    # are 0 because idx < NUM_CLASS. The embedding table is folded into w_ref.
    cls = jax.lax.broadcasted_iota(jnp.int32, (B, H), 1)
    onehot = (cls == idx_ref[...]).astype(f32)                    # [B, H]

    def lstm_cell(gates, c_prev):
        # Single EUP pass over the whole [B, 4H] = [8, 128] gate vreg; the
        # g-quarter preactivation was pre-scaled x2 so tanh(x) = 2*sigmoid(2x)-1.
        s = jax.nn.sigmoid(gates)
        i = s[:, 0 * H:1 * H]
        f = s[:, 1 * H:2 * H]
        g = 2.0 * s[:, 2 * H:3 * H] - 1.0
        o = s[:, 3 * H:4 * H]
        c_new = f * c_prev + i * g
        h_new = o * jnp.tanh(c_new)
        return h_new, c_new

    # ---- layer 0: tiny x-part matmul + fused [onehot | h_prev0] matmul -------
    gates = (jnp.dot(x_ref[...], w_ref[0:XPAD, :], preferred_element_type=f32)
             + jnp.dot(jnp.concatenate([onehot, h0_ref[0]], axis=1),
                       w_ref[XPAD:XPAD + 2 * H, :], preferred_element_type=f32)
             + b_ref[0])                                          # [B, 4H]
    h_new, c_new = lstm_cell(gates, c0_ref[0])
    hout_ref[0] = h_new                                           # in-place (aliased)
    cout_ref[0] = c_new
    hs = [h_new]

    # ---- layers 1..L-1: one fused [h_in | h_prev] x [2H, 4H] matmul each -----
    for l in range(1, L):
        row0 = XPAD + l * 2 * H
        gates = (jnp.dot(jnp.concatenate([h_new, h0_ref[l]], axis=1),
                         w_ref[row0:row0 + 2 * H, :], preferred_element_type=f32)
                 + b_ref[l])
        h_new, c_new = lstm_cell(gates, c0_ref[l])
        hout_ref[l] = h_new
        cout_ref[l] = c_new
        hs.append(h_new)

    # ---- fused Gaussian head: [B, L*H] x [L*H, 2]; lane 0 = mu, lane 1 = presigma
    hcat = jnp.concatenate(hs, axis=1)                            # [B, L*H] in-register
    head = (jnp.dot(hcat, head_ref[0:L * H, :], preferred_element_type=f32)
            + head_ref[L * H:L * H + 1, :])                       # [B, 2]
    lane = jax.lax.broadcasted_iota(jnp.int32, head.shape, 1)
    out_ref[...] = jnp.where(lane == 0, head, _softplus(head))    # single store


# --------------------------- one-time param packing ---------------------------
def pack_params(params):
    """Pad / transpose / fuse / fold weights ONCE, outside the per-step hot path."""
    H, L = LSTM_HIDDEN_DIM, LSTM_LAYERS
    f32 = jnp.float32
    emb = jnp.asarray(params["emb"], f32)                          # [NC, E]
    w_ih0 = jnp.asarray(params["w_ih"][0], f32)                    # [4H, 13]

    # layer-0 x part (z_{t-1} + covariates), padded to 8 rows for an aligned K
    wx0 = jnp.zeros((XPAD, 4 * H), f32).at[:X_DIM, :].set(w_ih0[:, :X_DIM].T)
    # layer-0 embedding part folded through the table: onehot @ (E @ W_e^T)
    w_idx0 = jnp.dot(emb, w_ih0[:, X_DIM:X_DIM + EMBEDDING_DIM].T,
                     precision=jax.lax.Precision.HIGHEST)          # [NC, 4H]
    w_oh0 = jnp.zeros((H, 4 * H), f32).at[:NUM_CLASS, :].set(w_idx0)

    blocks = [wx0, w_oh0, jnp.asarray(params["w_hh"][0], f32).T]
    for l in range(1, L):
        blocks.append(jnp.asarray(params["w_ih"][l], f32).T)       # input part
        blocks.append(jnp.asarray(params["w_hh"][l], f32).T)       # recurrent part
    w_all = jnp.concatenate(blocks, axis=0)                        # [8 + 2LH, 4H] = [200,128]

    b = jnp.asarray(params["b_ih"] + params["b_hh"], f32)          # [L, 4H]

    # tanh via sigmoid: pre-scale the g-gate quarter (cols 2H..3H) by 2
    w_all = w_all.at[:, 2 * H:3 * H].multiply(2.0)
    b = b.at[:, 2 * H:3 * H].multiply(2.0)[:, None, :]             # [L, 1, 4H]

    # Fused head: hcat[b, l*H + h] = hidden[l, b, h], torch uses hp[b, h*L + l]
    #  -> w_head[l*H + h] = W[0, h*L + l]. Bias packed as the last row.
    wmu = jnp.asarray(params["W_mu"], f32)[0].reshape(H, L).T.reshape(L * H)
    wsig = jnp.asarray(params["W_presigma"], f32)[0].reshape(H, L).T.reshape(L * H)
    w_head = jnp.stack([wmu, wsig], axis=1)                        # [L*H, 2]
    b_head = jnp.concatenate([jnp.asarray(params["b_mu"], f32),
                              jnp.asarray(params["b_presigma"], f32)])[None, :]
    head = jnp.concatenate([w_head, b_head], axis=0)               # [L*H + 1, 2]

    return {"w_all": w_all, "b": b, "head": head}


# ------------------------------- wrapper -------------------------------------
@partial(jax.jit, donate_argnums=(2, 3))
def deepar_forward(x, idx, hidden, cell, packed):
    """Pallas implementation of Net.forward (single decode step).

    x:      [1, B, 1+cov_dim]   f32
    idx:    [1, B]              int32
    hidden: [L, B, H]           f32   (donated, updated in place)
    cell:   [L, B, H]           f32   (donated, updated in place)
    packed: output of pack_params()
    returns (mu [B], sigma [B], hidden [L,B,H], cell [L,B,H])
    """
    L, B, H = hidden.shape
    assert H >= NUM_CLASS and 4 * H == 128

    # Only remaining XLA glue: tiny pad of x to 8 lanes + idx reshape.
    x8 = jnp.pad(x[0], ((0, 0), (0, XPAD - X_DIM)))                # [B, 8]
    idx2 = idx[0].astype(jnp.int32)[:, None]                       # [B, 1]

    vmem = pl.BlockSpec(memory_space=pltpu.MemorySpace.VMEM)

    out, h_out, c_out = pl.pallas_call(
        deepar_step_kernel,
        out_shape=(
            jax.ShapeDtypeStruct((B, 2), jnp.float32),             # packed mu / sigma
            jax.ShapeDtypeStruct((L, B, H), jnp.float32),
            jax.ShapeDtypeStruct((L, B, H), jnp.float32),
        ),
        in_specs=[vmem] * 7,
        out_specs=(vmem, vmem, vmem),
        input_output_aliases={2: 1, 3: 2},                         # hidden, cell in place
    )(x8, idx2, hidden, cell, packed["w_all"], packed["b"], packed["head"])

    return out[:, 0], out[:, 1], h_out, c_out


# --------------------------- pure-JAX reference ------------------------------
def deepar_forward_ref(x, idx, hidden, cell, params):
    L, B, H = hidden.shape
    emb = params["emb"][idx[0]]
    cur = jnp.concatenate([x[0], emb], axis=-1)
    hs, cs = [], []
    for l in range(L):
        gates = (cur @ params["w_ih"][l].T + params["b_ih"][l]
                 + hidden[l] @ params["w_hh"][l].T + params["b_hh"][l])
        i = jax.nn.sigmoid(gates[:, 0 * H:1 * H])
        f = jax.nn.sigmoid(gates[:, 1 * H:2 * H])
        g = jnp.tanh(gates[:, 2 * H:3 * H])
        o = jax.nn.sigmoid(gates[:, 3 * H:4 * H])
        c_new = f * cell[l] + i * g
        h_new = o * jnp.tanh(c_new)
        hs.append(h_new)
        cs.append(c_new)
        cur = h_new
    h_out = jnp.stack(hs)
    c_out = jnp.stack(cs)
    hp = jnp.transpose(h_out, (1, 2, 0)).reshape(B, H * L)
    mu = hp @ params["W_mu"][0] + params["b_mu"][0]
    pre = hp @ params["W_presigma"][0] + params["b_presigma"][0]
    return mu, _softplus(pre), h_out, c_out


# ------------------------------ param init -----------------------------------
def init_params(key):
    H, L, E = LSTM_HIDDEN_DIM, LSTM_LAYERS, EMBEDDING_DIM
    ks = jax.random.split(key, 16)
    bound = 1.0 / jnp.sqrt(H)
    params = {}
    params["emb"] = jax.random.normal(ks[0], (NUM_CLASS, E), jnp.float32)

    w_ih, w_hh, b_ih, b_hh = [], [], [], []
    for l in range(L):
        d_l = D_IN if l == 0 else H
        w_ih.append(jax.random.uniform(ks[1 + l], (4 * H, d_l),
                                       minval=-bound, maxval=bound))
        w_hh.append(jax.random.uniform(ks[4 + l], (4 * H, H),
                                       minval=-bound, maxval=bound))
        bi = jax.random.uniform(ks[7 + l], (4 * H,), minval=-bound, maxval=bound)
        bh = jax.random.uniform(ks[10 + l], (4 * H,), minval=-bound, maxval=bound)
        # forget-gate bias filled with 1.0 (as in the PyTorch __init__)
        bi = bi.at[H:2 * H].set(1.0)
        bh = bh.at[H:2 * H].set(1.0)
        b_ih.append(bi)
        b_hh.append(bh)
    params["w_ih"] = w_ih                     # list: [4H, D_l] per layer
    params["w_hh"] = jnp.stack(w_hh)          # [L, 4H, H]
    params["b_ih"] = jnp.stack(b_ih)          # [L, 4H]
    params["b_hh"] = jnp.stack(b_hh)          # [L, 4H]

    in_f = H * L
    lin_bound = 1.0 / jnp.sqrt(in_f)
    params["W_mu"] = jax.random.uniform(ks[13], (1, in_f),
                                        minval=-lin_bound, maxval=lin_bound)
    params["b_mu"] = jax.random.uniform(ks[14], (1,),
                                        minval=-lin_bound, maxval=lin_bound)
    params["W_presigma"] = jax.random.uniform(ks[15], (1, in_f),
                                              minval=-lin_bound, maxval=lin_bound)
    params["b_presigma"] = jnp.zeros((1,), jnp.float32)
    return params


# ---------------------------------- main --------------------------------------
if __name__ == "__main__":
    key = jax.random.PRNGKey(0)
    kp, kx, ki, kh, kc = jax.random.split(key, 5)

    params = init_params(kp)
    packed = pack_params(params)              # one-time packing, outside hot path

    x = jax.random.normal(kx, (1, BATCH, 1 + COV_DIM), jnp.float32)
    idx = jax.random.randint(ki, (1, BATCH), 0, NUM_CLASS, jnp.int32)
    hidden = 0.1 * jax.random.normal(kh, (LSTM_LAYERS, BATCH, LSTM_HIDDEN_DIM),
                                     jnp.float32)
    cell = 0.1 * jax.random.normal(kc, (LSTM_LAYERS, BATCH, LSTM_HIDDEN_DIM),
                                   jnp.float32)

    # reference first: hidden/cell are donated (invalidated) by the kernel call
    mu_r, sigma_r, h_r, c_r = deepar_forward_ref(x, idx, hidden, cell, params)

    mu, sigma, h_new, c_new = deepar_forward(x, idx, hidden, cell, packed)
    jax.block_until_ready((mu, sigma, h_new, c_new))

    assert mu.shape == (BATCH,) and sigma.shape == (BATCH,)
    assert h_new.shape == (LSTM_LAYERS, BATCH, LSTM_HIDDEN_DIM)
    assert jnp.allclose(mu, mu_r, atol=1e-3, rtol=1e-3)
    assert jnp.allclose(sigma, sigma_r, atol=1e-3, rtol=1e-3)
    assert jnp.allclose(h_new, h_r, atol=1e-3, rtol=1e-3)
    assert jnp.allclose(c_new, c_r, atol=1e-3, rtol=1e-3)

    print("KERNEL_OK")
</pallas_src>

<mosaic_0001>
module attributes {stable_mosaic.version = 11 : i64} {
  func.func @deepar_step_kernel(%arg0: memref<8x8xf32, #tpu.memory_space<vmem>>, %arg1: memref<8x1xi32, #tpu.memory_space<vmem>>, %arg2: memref<3x8x32xf32, #tpu.memory_space<vmem>>, %arg3: memref<3x8x32xf32, #tpu.memory_space<vmem>>, %arg4: memref<200x128xf32, #tpu.memory_space<vmem>>, %arg5: memref<3x1x128xf32, #tpu.memory_space<vmem>>, %arg6: memref<97x2xf32, #tpu.memory_space<vmem>>, %arg7: memref<8x2xf32, #tpu.memory_space<vmem>>, %arg8: memref<3x8x32xf32, #tpu.memory_space<vmem>>, %arg9: memref<3x8x32xf32, #tpu.memory_space<vmem>>) attributes {dimension_semantics = [], scalar_prefetch = 0 : i64, scratch_operands = 0 : i64, tpu.core_type = #tpu.core_type<tc>} {
    %0 = tpu.iota {dimensions = array<i32: 1>} : vector<8x32xi32>
    %c0 = arith.constant 0 : index
    %c0_0 = arith.constant 0 : index
    %1 = vector.load %arg1[%c0, %c0_0] : memref<8x1xi32, #tpu.memory_space<vmem>>, vector<8x1xi32>
    %2 = vector.broadcast %1 : vector<8x1xi32> to vector<8x32xi32>
    %3 = arith.cmpi eq, %0, %2 : vector<8x32xi32>
    %4 = arith.extui %3 : vector<8x32xi1> to vector<8x32xi32>
    %5 = arith.sitofp %4 : vector<8x32xi32> to vector<8x32xf32>
    %c0_1 = arith.constant 0 : index
    %c0_2 = arith.constant 0 : index
    %6 = vector.load %arg0[%c0_1, %c0_2] : memref<8x8xf32, #tpu.memory_space<vmem>>, vector<8x8xf32>
    %c0_3 = arith.constant 0 : index
    %c0_4 = arith.constant 0 : index
    %7 = vector.load %arg4[%c0_3, %c0_4] : memref<200x128xf32, #tpu.memory_space<vmem>>, vector<8x128xf32>
    %cst = arith.constant dense<0.000000e+00> : vector<8x128xf32>
    %8 = tpu.matmul %6, %7, %cst {dimension_numbers = #tpu.dot_dimension_numbers<[1], [0], [0], [1], [0, 0, 1, 1], [], []>} : vector<8x8xf32>, vector<8x128xf32>, vector<8x128xf32> -> vector<8x128xf32>
    %c0_5 = arith.constant 0 : index
    %c0_6 = arith.constant 0 : index
    %c0_7 = arith.constant 0 : index
    %9 = vector.load %arg2[%c0_5, %c0_6, %c0_7] : memref<3x8x32xf32, #tpu.memory_space<vmem>>, vector<1x8x32xf32>
    %10 = vector.shape_cast %9 : vector<1x8x32xf32> to vector<8x32xf32>
    %11 = tpu.concatenate %5, %10 in 1 : vector<8x32xf32>, vector<8x32xf32> -> vector<8x64xf32>
    %c8 = arith.constant 8 : index
    %c0_8 = arith.constant 0 : index
    %12 = vector.load %arg4[%c8, %c0_8] : memref<200x128xf32, #tpu.memory_space<vmem>>, vector<64x128xf32>
    %cst_9 = arith.constant dense<0.000000e+00> : vector<8x128xf32>
    %13 = tpu.matmul %11, %12, %cst_9 {dimension_numbers = #tpu.dot_dimension_numbers<[1], [0], [0], [1], [0, 0, 1, 1], [], []>} : vector<8x64xf32>, vector<64x128xf32>, vector<8x128xf32> -> vector<8x128xf32>
    %14 = arith.addf %8, %13 : vector<8x128xf32>
    %c0_10 = arith.constant 0 : index
    %c0_11 = arith.constant 0 : index
    %c0_12 = arith.constant 0 : index
    %15 = vector.load %arg5[%c0_10, %c0_11, %c0_12] : memref<3x1x128xf32, #tpu.memory_space<vmem>>, vector<1x1x128xf32>
    %16 = vector.shape_cast %15 : vector<1x1x128xf32> to vector<1x128xf32>
    %17 = vector.broadcast %16 : vector<1x128xf32> to vector<8x128xf32>
    %18 = arith.addf %14, %17 : vector<8x128xf32>
    %c0_13 = arith.constant 0 : index
    %c0_14 = arith.constant 0 : index
    %c0_15 = arith.constant 0 : index
    %19 = vector.load %arg3[%c0_13, %c0_14, %c0_15] : memref<3x8x32xf32, #tpu.memory_space<vmem>>, vector<1x8x32xf32>
    %20 = vector.shape_cast %19 : vector<1x8x32xf32> to vector<8x32xf32>
    %21 = arith.negf %18 : vector<8x128xf32>
    %22 = math.exp %21 : vector<8x128xf32>
    %cst_16 = arith.constant 1.000000e+00 : f32
    %23 = vector.broadcast %cst_16 : f32 to vector<8x128xf32>
    %24 = arith.addf %23, %22 : vector<8x128xf32>
    %25 = arith.divf %23, %24 : vector<8x128xf32>
    %26 = vector.extract_strided_slice %25 {offsets = [0, 0], sizes = [8, 32], strides = [1, 1]} : vector<8x128xf32> to vector<8x32xf32>
    %27 = vector.extract_strided_slice %25 {offsets = [0, 32], sizes = [8, 32], strides = [1, 1]} : vector<8x128xf32> to vector<8x32xf32>
    %28 = vector.extract_strided_slice %25 {offsets = [0, 64], sizes = [8, 32], strides = [1, 1]} : vector<8x128xf32> to vector<8x32xf32>
    %cst_17 = arith.constant 2.000000e+00 : f32
    %29 = vector.broadcast %cst_17 : f32 to vector<8x32xf32>
    %30 = arith.mulf %29, %28 : vector<8x32xf32>
    %cst_18 = arith.constant 1.000000e+00 : f32
    %31 = vector.broadcast %cst_18 : f32 to vector<8x32xf32>
    %32 = arith.subf %30, %31 : vector<8x32xf32>
    %33 = vector.extract_strided_slice %25 {offsets = [0, 96], sizes = [8, 32], strides = [1, 1]} : vector<8x128xf32> to vector<8x32xf32>
    %34 = arith.mulf %27, %20 : vector<8x32xf32>
    %35 = arith.mulf %26, %32 : vector<8x32xf32>
    %36 = arith.addf %34, %35 : vector<8x32xf32>
    %37 = math.tanh %36 : vector<8x32xf32>
    %38 = arith.mulf %33, %37 : vector<8x32xf32>
    %c0_19 = arith.constant 0 : index
    %c0_20 = arith.constant 0 : index
    %c0_21 = arith.constant 0 : index
    %39 = vector.load %arg8[%c0_19, %c0_20, %c0_21] : memref<3x8x32xf32, #tpu.memory_space<vmem>>, vector<1x8x32xf32>
    %40 = vector.shape_cast %39 : vector<1x8x32xf32> to vector<8x32xf32>
    %41 = vector.shape_cast %38 : vector<8x32xf32> to vector<1x8x32xf32>
    tpu.vector_store %arg8[%c0_19, %c0_20, %c0_21], %41 {strides = array<i32>} : memref<3x8x32xf32, #tpu.memory_space<vmem>>, vector<1x8x32xf32>,
    %c0_22 = arith.constant 0 : index
    %c0_23 = arith.constant 0 : index
    %c0_24 = arith.constant 0 : index
    %42 = vector.load %arg9[%c0_22, %c0_23, %c0_24] : memref<3x8x32xf32, #tpu.memory_space<vmem>>, vector<1x8x32xf32>
    %43 = vector.shape_cast %42 : vector<1x8x32xf32> to vector<8x32xf32>
    %44 = vector.shape_cast %36 : vector<8x32xf32> to vector<1x8x32xf32>
    tpu.vector_store %arg9[%c0_22, %c0_23, %c0_24], %44 {strides = array<i32>} : memref<3x8x32xf32, #tpu.memory_space<vmem>>, vector<1x8x32xf32>,
    %c1 = arith.constant 1 : index
    %c0_25 = arith.constant 0 : index
    %c0_26 = arith.constant 0 : index
    %45 = vector.load %arg2[%c1, %c0_25, %c0_26] : memref<3x8x32xf32, #tpu.memory_space<vmem>>, vector<1x8x32xf32>
    %46 = vector.shape_cast %45 : vector<1x8x32xf32> to vector<8x32xf32>
    %47 = tpu.concatenate %38, %46 in 1 : vector<8x32xf32>, vector<8x32xf32> -> vector<8x64xf32>
    %c72 = arith.constant 72 : index
    %c0_27 = arith.constant 0 : index
    %48 = vector.load %arg4[%c72, %c0_27] : memref<200x128xf32, #tpu.memory_space<vmem>>, vector<64x128xf32>
    %cst_28 = arith.constant dense<0.000000e+00> : vector<8x128xf32>
    %49 = tpu.matmul %47, %48, %cst_28 {dimension_numbers = #tpu.dot_dimension_numbers<[1], [0], [0], [1], [0, 0, 1, 1], [], []>} : vector<8x64xf32>, vector<64x128xf32>, vector<8x128xf32> -> vector<8x128xf32>
    %c1_29 = arith.constant 1 : index
    %c0_30 = arith.constant 0 : index
    %c0_31 = arith.constant 0 : index
    %50 = vector.load %arg5[%c1_29, %c0_30, %c0_31] : memref<3x1x128xf32, #tpu.memory_space<vmem>>, vector<1x1x128xf32>
    %51 = vector.shape_cast %50 : vector<1x1x128xf32> to vector<1x128xf32>
    %52 = vector.broadcast %51 : vector<1x128xf32> to vector<8x128xf32>
    %53 = arith.addf %49, %52 : vector<8x128xf32>
    %c1_32 = arith.constant 1 : index
    %c0_33 = arith.constant 0 : index
    %c0_34 = arith.constant 0 : index
    %54 = vector.load %arg3[%c1_32, %c0_33, %c0_34] : memref<3x8x32xf32, #tpu.memory_space<vmem>>, vector<1x8x32xf32>
    %55 = vector.shape_cast %54 : vector<1x8x32xf32> to vector<8x32xf32>
    %56 = arith.negf %53 : vector<8x128xf32>
    %57 = math.exp %56 : vector<8x128xf32>
    %cst_35 = arith.constant 1.000000e+00 : f32
    %58 = vector.broadcast %cst_35 : f32 to vector<8x128xf32>
    %59 = arith.addf %58, %57 : vector<8x128xf32>
    %60 = arith.divf %58, %59 : vector<8x128xf32>
    %61 = vector.extract_strided_slice %60 {offsets = [0, 0], sizes = [8, 32], strides = [1, 1]} : vector<8x128xf32> to vector<8x32xf32>
    %62 = vector.extract_strided_slice %60 {offsets = [0, 32], sizes = [8, 32], strides = [1, 1]} : vector<8x128xf32> to vector<8x32xf32>
    %63 = vector.extract_strided_slice %60 {offsets = [0, 64], sizes = [8, 32], strides = [1, 1]} : vector<8x128xf32> to vector<8x32xf32>
    %cst_36 = arith.constant 2.000000e+00 : f32
    %64 = vector.broadcast %cst_36 : f32 to vector<8x32xf32>
    %65 = arith.mulf %64, %63 : vector<8x32xf32>
    %cst_37 = arith.constant 1.000000e+00 : f32
    %66 = vector.broadcast %cst_37 : f32 to vector<8x32xf32>
    %67 = arith.subf %65, %66 : vector<8x32xf32>
    %68 = vector.extract_strided_slice %60 {offsets = [0, 96], sizes = [8, 32], strides = [1, 1]} : vector<8x128xf32> to vector<8x32xf32>
    %69 = arith.mulf %62, %55 : vector<8x32xf32>
    %70 = arith.mulf %61, %67 : vector<8x32xf32>
    %71 = arith.addf %69, %70 : vector<8x32xf32>
    %72 = math.tanh %71 : vector<8x32xf32>
    %73 = arith.mulf %68, %72 : vector<8x32xf32>
    %c1_38 = arith.constant 1 : index
    %c0_39 = arith.constant 0 : index
    %c0_40 = arith.constant 0 : index
    %74 = vector.load %arg8[%c1_38, %c0_39, %c0_40] : memref<3x8x32xf32, #tpu.memory_space<vmem>>, vector<1x8x32xf32>
    %75 = vector.shape_cast %74 : vector<1x8x32xf32> to vector<8x32xf32>
    %76 = vector.shape_cast %73 : vector<8x32xf32> to vector<1x8x32xf32>
    tpu.vector_store %arg8[%c1_38, %c0_39, %c0_40], %76 {strides = array<i32>} : memref<3x8x32xf32, #tpu.memory_space<vmem>>, vector<1x8x32xf32>,
    %c1_41 = arith.constant 1 : index
    %c0_42 = arith.constant 0 : index
    %c0_43 = arith.constant 0 : index
    %77 = vector.load %arg9[%c1_41, %c0_42, %c0_43] : memref<3x8x32xf32, #tpu.memory_space<vmem>>, vector<1x8x32xf32>
    %78 = vector.shape_cast %77 : vector<1x8x32xf32> to vector<8x32xf32>
    %79 = vector.shape_cast %71 : vector<8x32xf32> to vector<1x8x32xf32>
    tpu.vector_store %arg9[%c1_41, %c0_42, %c0_43], %79 {strides = array<i32>} : memref<3x8x32xf32, #tpu.memory_space<vmem>>, vector<1x8x32xf32>,
    %c2 = arith.constant 2 : index
    %c0_44 = arith.constant 0 : index
    %c0_45 = arith.constant 0 : index
    %80 = vector.load %arg2[%c2, %c0_44, %c0_45] : memref<3x8x32xf32, #tpu.memory_space<vmem>>, vector<1x8x32xf32>
    %81 = vector.shape_cast %80 : vector<1x8x32xf32> to vector<8x32xf32>
    %82 = tpu.concatenate %73, %81 in 1 : vector<8x32xf32>, vector<8x32xf32> -> vector<8x64xf32>
    %c136 = arith.constant 136 : index
    %c0_46 = arith.constant 0 : index
    %83 = vector.load %arg4[%c136, %c0_46] : memref<200x128xf32, #tpu.memory_space<vmem>>, vector<64x128xf32>
    %cst_47 = arith.constant dense<0.000000e+00> : vector<8x128xf32>
    %84 = tpu.matmul %82, %83, %cst_47 {dimension_numbers = #tpu.dot_dimension_numbers<[1], [0], [0], [1], [0, 0, 1, 1], [], []>} : vector<8x64xf32>, vector<64x128xf32>, vector<8x128xf32> -> vector<8x128xf32>
    %c2_48 = arith.constant 2 : index
    %c0_49 = arith.constant 0 : index
    %c0_50 = arith.constant 0 : index
    %85 = vector.load %arg5[%c2_48, %c0_49, %c0_50] : memref<3x1x128xf32, #tpu.memory_space<vmem>>, vector<1x1x128xf32>
    %86 = vector.shape_cast %85 : vector<1x1x128xf32> to vector<1x128xf32>
    %87 = vector.broadcast %86 : vector<1x128xf32> to vector<8x128xf32>
    %88 = arith.addf %84, %87 : vector<8x128xf32>
    %c2_51 = arith.constant 2 : index
    %c0_52 = arith.constant 0 : index
    %c0_53 = arith.constant 0 : index
    %89 = vector.load %arg3[%c2_51, %c0_52, %c0_53] : memref<3x8x32xf32, #tpu.memory_space<vmem>>, vector<1x8x32xf32>
    %90 = vector.shape_cast %89 : vector<1x8x32xf32> to vector<8x32xf32>
    %91 = arith.negf %88 : vector<8x128xf32>
    %92 = math.exp %91 : vector<8x128xf32>
    %cst_54 = arith.constant 1.000000e+00 : f32
    %93 = vector.broadcast %cst_54 : f32 to vector<8x128xf32>
    %94 = arith.addf %93, %92 : vector<8x128xf32>
    %95 = arith.divf %93, %94 : vector<8x128xf32>
    %96 = vector.extract_strided_slice %95 {offsets = [0, 0], sizes = [8, 32], strides = [1, 1]} : vector<8x128xf32> to vector<8x32xf32>
    %97 = vector.extract_strided_slice %95 {offsets = [0, 32], sizes = [8, 32], strides = [1, 1]} : vector<8x128xf32> to vector<8x32xf32>
    %98 = vector.extract_strided_slice %95 {offsets = [0, 64], sizes = [8, 32], strides = [1, 1]} : vector<8x128xf32> to vector<8x32xf32>
    %cst_55 = arith.constant 2.000000e+00 : f32
    %99 = vector.broadcast %cst_55 : f32 to vector<8x32xf32>
    %100 = arith.mulf %99, %98 : vector<8x32xf32>
    %cst_56 = arith.constant 1.000000e+00 : f32
    %101 = vector.broadcast %cst_56 : f32 to vector<8x32xf32>
    %102 = arith.subf %100, %101 : vector<8x32xf32>
    %103 = vector.extract_strided_slice %95 {offsets = [0, 96], sizes = [8, 32], strides = [1, 1]} : vector<8x128xf32> to vector<8x32xf32>
    %104 = arith.mulf %97, %90 : vector<8x32xf32>
    %105 = arith.mulf %96, %102 : vector<8x32xf32>
    %106 = arith.addf %104, %105 : vector<8x32xf32>
    %107 = math.tanh %106 : vector<8x32xf32>
    %108 = arith.mulf %103, %107 : vector<8x32xf32>
    %c2_57 = arith.constant 2 : index
    %c0_58 = arith.constant 0 : index
    %c0_59 = arith.constant 0 : index
    %109 = vector.load %arg8[%c2_57, %c0_58, %c0_59] : memref<3x8x32xf32, #tpu.memory_space<vmem>>, vector<1x8x32xf32>
    %110 = vector.shape_cast %109 : vector<1x8x32xf32> to vector<8x32xf32>
    %111 = vector.shape_cast %108 : vector<8x32xf32> to vector<1x8x32xf32>
    tpu.vector_store %arg8[%c2_57, %c0_58, %c0_59], %111 {strides = array<i32>} : memref<3x8x32xf32, #tpu.memory_space<vmem>>, vector<1x8x32xf32>,
    %c2_60 = arith.constant 2 : index
    %c0_61 = arith.constant 0 : index
    %c0_62 = arith.constant 0 : index
    %112 = vector.load %arg9[%c2_60, %c0_61, %c0_62] : memref<3x8x32xf32, #tpu.memory_space<vmem>>, vector<1x8x32xf32>
    %113 = vector.shape_cast %112 : vector<1x8x32xf32> to vector<8x32xf32>
    %114 = vector.shape_cast %106 : vector<8x32xf32> to vector<1x8x32xf32>
    tpu.vector_store %arg9[%c2_60, %c0_61, %c0_62], %114 {strides = array<i32>} : memref<3x8x32xf32, #tpu.memory_space<vmem>>, vector<1x8x32xf32>,
    %115 = tpu.concatenate %38, %73, %108 in 1 : vector<8x32xf32>, vector<8x32xf32>, vector<8x32xf32> -> vector<8x96xf32>
    %c0_63 = arith.constant 0 : index
    %c0_64 = arith.constant 0 : index
    %116 = vector.load %arg6[%c0_63, %c0_64] : memref<97x2xf32, #tpu.memory_space<vmem>>, vector<96x2xf32>
    %cst_65 = arith.constant dense<0.000000e+00> : vector<8x2xf32>
    %117 = tpu.matmul %115, %116, %cst_65 {dimension_numbers = #tpu.dot_dimension_numbers<[1], [0], [0], [1], [0, 0, 1, 1], [], []>} : vector<8x96xf32>, vector<96x2xf32>, vector<8x2xf32> -> vector<8x2xf32>
    %c96 = arith.constant 96 : index
    %c0_66 = arith.constant 0 : index
    %118 = vector.load %arg6[%c96, %c0_66] : memref<97x2xf32, #tpu.memory_space<vmem>>, vector<1x2xf32>
    %119 = vector.broadcast %118 : vector<1x2xf32> to vector<8x2xf32>
    %120 = arith.addf %117, %119 : vector<8x2xf32>
    %121 = tpu.iota {dimensions = array<i32: 1>} : vector<8x2xi32>
    %c0_i32 = arith.constant 0 : i32
    %122 = vector.broadcast %c0_i32 : i32 to vector<8x2xi32>
    %123 = arith.cmpi eq, %121, %122 : vector<8x2xi32>
    %cst_67 = arith.constant 2.000000e+01 : f32
    %124 = vector.broadcast %cst_67 : f32 to vector<8x2xf32>
    %125 = arith.cmpf ogt, %120, %124 : vector<8x2xf32>
    %cst_68 = arith.constant 2.000000e+01 : f32
    %126 = vector.broadcast %cst_68 : f32 to vector<8x2xf32>
    %127 = arith.minimumf %120, %126 : vector<8x2xf32>
    %128 = math.exp %127 : vector<8x2xf32>
    %129 = math.log1p %128 : vector<8x2xf32>
    %130 = arith.select %125, %120, %129 : vector<8x2xi1>, vector<8x2xf32>
    %131 = arith.select %123, %120, %130 : vector<8x2xi1>, vector<8x2xf32>
    %c0_69 = arith.constant 0 : index
    %c0_70 = arith.constant 0 : index
    %132 = vector.load %arg7[%c0_69, %c0_70] : memref<8x2xf32, #tpu.memory_space<vmem>>, vector<8x2xf32>
    tpu.vector_store %arg7[%c0_69, %c0_70], %131 {strides = array<i32>} : memref<8x2xf32, #tpu.memory_space<vmem>>, vector<8x2xf32>,
    return
  }
}

</mosaic_0001>

<bundles_post_ra>
// kernel: deepar_forward.1
= control target key start
LH: loop header
LB: loop body
LE: loop exit
PB: predicated region body
PF: predicated region fallthrough
CT: control target
= control target key end

     0   :  { %15 = vsyncpa [#allocation3], 0  ;;  %s535_s12 = smov [#allocation2]   ;;  %s536_s14 = smov 128   ;;  %s742_s0 = inlined_call_operand.vmem [shape: f32[8,8], index: 0, kind: input, shape index: {}]   ;;  %s743_s1 = inlined_call_operand.vmem [shape: s32[8,1], index: 1, kind: input, shape index: {}]   ;;  %s744_s2 = inlined_call_operand.vmem [shape: f32[3,8,32], index: 2, kind: input, shape index: {}, may-alias: {2,8}]   ;;  %s745_s3 = inlined_call_operand.vmem [shape: f32[3,8,32], index: 3, kind: input, shape index: {}, may-alias: {3,9}]   ;;  %s746_s4 = inlined_call_operand.hbm [shape: f32[200,128], index: 4, kind: input, shape index: {}]   ;;  %s747_s5 = inlined_call_operand.vmem [shape: f32[3,1,128], index: 5, kind: input, shape index: {}]   ;;  %s748_s6 = inlined_call_operand.vmem [shape: f32[97,2], index: 6, kind: input, shape index: {}]   ;;  %s749_s7 = inlined_call_operand.vmem [shape: f32[8,2], index: 7, kind: output, shape index: {0}]   ;;  %s750_s8 = inlined_call_operand.vmem [shape: f32[3,8,32], index: 8, kind: output, shape index: {1}, may-alias: {2,8}]   ;;  %s751_s9 = inlined_call_operand.vmem [shape: f32[3,8,32], index: 9, kind: output, shape index: {2}, may-alias: {3,9}]  }
   0x1   :  { %s28_s11 = sshll.u32 %s746_s4, 4  ;;  %s30_s13 = sshll.u32 %s535_s12, 4  ;;  %s29_s11 = int_to_ptr.hbm [resolvable:$true] %s28_s11  ;;  %s31_s13 = int_to_ptr.vmem [resolvable:$true] %s30_s13 }
   0x2   :  { %s537_s15 = smov 8  }
   0x3   :  { %36 = dma.hbm_to_vmem [thread:$0]  %s29_s11, 3200, %s31_s13, [#allocation3], %s536_s14, %s536_s14, %s537_s15  }
   0x4   :  { %533 = dma.done.wait [#allocation3], 3200  }
   0x5   :  { %534 = vsyncadd [#allocation3], 4294964096  ;;  %v538_v0 = vmov 0   ;;  %v47_v1 = vld [vmem:[%s743_s1] sm:$0xff]  ;;  %v69_v3 = vld [vmem:[#allocation2 + $0x38] sm:$0xff]  ;;  %s539_s19 = smov 32   ;;  %v45_v13 = vlaneseq }
   0x6   :  { %482 = vset.pattern.permute.xlu0 %v538_v0  ;;  %v70_v2 = vld [vmem:[#allocation2 + $0x40] sm:$0xff]  ;;  %v68_v4 = vld [vmem:[#allocation2 + $0x30] sm:$0xff]  ;;  %v67_v6 = vld [vmem:[#allocation2 + $0x28] sm:$0xff]  ;;  %vm95_vm0 = vcmask 64512   ;;  %vm61_vm2 = vcmask 261120   ;;  %vm71_vm3 = vcmask 523264  }
   0x7   :  { %49 = vperm.xlu0 %482, %v47_v1   ;;  %83 = vmatpush.msra.mxu0 %v70_v2  ;;  %v56_v5 = vld [vmem:[%s744_s2] sm:$0xff]  ;;  %v65_v10 = vld [vmem:[#allocation2 + $0x18] sm:$0xff]  ;;  %v64_v11 = vld [vmem:[#allocation2 + $0x10] sm:$0xff]  ;;  %v606_v15 = vand.u32 127, %v45_v13  ;;  %v540_v16 = vmov 0.0   ;;  %s541_s22 = smov 64  }
   0x8   :  { %v66_v7 = vld [vmem:[#allocation2 + $0x20] sm:$0xff]  ;;  %v63_v12 = vld [vmem:[#allocation2 + $0x8] sm:$0xff]  ;;  %v190_v50 = vld [vmem:[#allocation2 + $0x78] sm:$0xff]  ;;  %s542_s15 = smov 96  }
   0x9   :  { %84 = vmatpush.msra.mxu0 %v69_v3  ;;  %v55_v8 = vld [vmem:[#allocation2] sm:$0xff]  ;;  %v457_v48 = vld [vmem:[%s744_s2 + $0x8] sm:$0xff]  ;;  %v189_v51 = vld [vmem:[#allocation2 + $0x70] sm:$0xff] }
   0xa   :  { %v54_v9 = vld [vmem:[%s742_s0] sm:$0xff]  ;;  %114 = vmatpush.msra.mxu2 %v55_v8  ;;  %v188_v52 = vld [vmem:[#allocation2 + $0x68] sm:$0xff]  ;;  %v186_v54 = vld [vmem:[#allocation2 + $0x58] sm:$0xff] }
   0xb   :  { %85 = vmatpush.msra.mxu0 %v68_v4  ;;  %454 = vmatmul.msk.f32.vlgmr.msra.gmra.mxu2 %vm95_vm0, %v54_v9  ;;  %v483_v21 = vld [vmem:[%s747_s5] ss:$0 sm:$0xff]  ;;  %v185_v55 = vld [vmem:[#allocation2 + $0x50] sm:$0xff]  ;;  %v184_v58 = vld [vmem:[#allocation2 + $0x48] sm:$0xff]  ;;  %vm397_vm0 = vcmask 785408  }
   0xc   :  { %v124_v40 = vld [vmem:[%s745_s3] sm:$0xff]  ;;  %v460_v59 = vld [vmem:[%s745_s3 + $0x8] sm:$0xff] }
   0xd   :  { %86 = vmatpush.msra.mxu0 %v67_v6  ;;  %v191_v49 = vld [vmem:[#allocation2 + $0x80] sm:$0xff] }
   0xe   :  { %208 = vmatpush.msrb.mxu2 %v191_v49  ;;  %v187_v53 = vld [vmem:[#allocation2 + $0x60] sm:$0xff] }
   0xf   :  { %58 = vrot.lane.b32.xlu0 %v56_v5, %s539_s19  ;;  %87 = vmatpush.msra.mxu0 %v66_v7  ;;  %v484_v63 = vld [vmem:[%s747_s5 + $0x1] ss:$0 sm:$0xff] }
  0x10   :  { %209 = vmatpush.msrb.mxu2 %v190_v50 }
  0x11   :  { %88 = vmatpush.msra.mxu0 %v65_v10 }
  0x12   :  { %210 = vmatpush.msrb.mxu2 %v189_v51 }
  0x13   :  { %89 = vmatpush.msra.mxu0 %v64_v11 }
  0x14   :  { %211 = vmatpush.msrb.mxu2 %v188_v52 }
  0x15   :  { %90 = vmatpush.msra.mxu0 %v63_v12 }
  0x16   :  { %212 = vmatpush.msrb.mxu2 %v187_v53 }
  0x18   :  { %213 = vmatpush.msrb.mxu2 %v186_v54 }
  0x1a   :  { %214 = vmatpush.msrb.mxu2 %v185_v55 }
  0x1c   :  { %215 = vmatpush.msrb.mxu2 %v184_v58 }
  0x79   :  { %v50_v14 = vpop.permute.xlu0 %49 }
  0x7a   :  { %vm51_vm1 = vcmp.eq.s32.totalorder %v606_v15, %v50_v14 }
  0x7b   :  { %v452_v17 = vsel %vm51_vm1, 1.0, %v540_v16  ;;  %vm421_vm1 = vcmp.eq.s32.totalorder %v606_v15, 0 }
  0x81   :  { %v59_v18 = vpop.permute.xlu0 %58 }
  0x82   :  { %v62_v19 = vsel %vm61_vm2, %v452_v17, %v59_v18 }
  0x83   :  { %453 = vmatmul.msk.f32.vlgmr.msra.gmra.mxu0 %vm71_vm3, %v62_v19 }
  0x8e   :  { %v116_v20 = vpop.f32.mrf.mxu2 }
 0x100   :  { %v92_v22 = vpop.f32.mrf.mxu0 }
 0x101   :  { %v117_v23 = vadd.f32 %v116_v20, %v92_v22 }
 0x103   :  { %v123_v24 = vadd.f32 %v483_v21, %v117_v23 }
 0x105   :  { %v455_v25 = vmul.f32 -1.442695, %v123_v24 }
 0x107   :  { %487 = vpow2.f32 %v455_v25 }
 0x10d   :  { %v488_v26 = vpop.eup %487 }
 0x10e   :  { %v128_v27 = vadd.f32 1.0, %v488_v26  ;;  %v290_v26 = vld [vmem:[#allocation2 + $0xc0] sm:$0xff] }
 0x10f   :  { %307 = vmatpush.msra.mxu3 %v290_v26 }
 0x110   :  { %489 = vrcp.f32 %v128_v27  ;;  %v140_v31 = vand.u32 2147483648, %v128_v27  ;;  %v138_v33 = vand.u32 2147483647, %v128_v27  ;;  %vm134_vm5 = vweird.f32 %v128_v27 }
 0x112   :  { %v141_v35 = vor.u32 1.1754944e-38, %v140_v31  ;;  %vm139_vm7 = vcmp.eq.f32.partialorder %v138_v33, 8.507059e+37  ;;  %v285_v33 = vld [vmem:[#allocation2 + $0x98] sm:$0xff] }
 0x116   :  { %v490_v28 = vpop.eup %489 }
 0x117   :  { %v130_v29 = vmul.f32 %v490_v28, %v128_v27  ;;  %vm135_vm4 = vweird.f32 %v490_v28  ;;  %v289_v27 = vld [vmem:[#allocation2 + $0xb8] sm:$0xff] }
 0x118   :  { %vm136_vm6 = vmor %vm134_vm5, %vm135_vm4  ;;  %308 = vmatpush.msra.mxu3 %v289_v27  ;;  %vm437_vm4 = vcmask 15360  }
 0x119   :  { %v131_v30 = vsub.f32 1.0, %v130_v29  ;;  %v287_v29 = vld [vmem:[#allocation2 + $0xa8] sm:$0xff] }
 0x11b   :  { %v132_v32 = vmul.f32 %v490_v28, %v131_v30 }
 0x11d   :  { %v133_v34 = vadd.f32 %v490_v28, %v132_v32  ;;  %v286_v32 = vld [vmem:[#allocation2 + $0xa0] sm:$0xff] }
 0x11f   :  { %v137_v36 = vsel %vm136_vm6, %v490_v28, %v133_v34  ;;  %v288_v28 = vld [vmem:[#allocation2 + $0xb0] sm:$0xff] }
 0x120   :  { %v142_v37 = vsel %vm139_vm7, %v141_v35, %v137_v36  ;;  %309 = vmatpush.msra.mxu3 %v288_v28  ;;  %v284_v34 = vld [vmem:[#allocation2 + $0x90] sm:$0xff]  ;;  %v283_v36 = vld [vmem:[#allocation2 + $0x88] sm:$0xff] }
 0x121   :  { %v144_v38 = vmul.f32 2.0, %v142_v37  ;;  %v468_v35 = vld [vmem:[%s745_s3 + $0x10] sm:$0xff] }
 0x122   :  { %310 = vmatpush.msra.mxu3 %v287_v29 }
 0x123   :  { %v456_v39 = vadd.f32 -1.0, %v144_v38 }
 0x124   :  { %311 = vmatpush.msra.mxu3 %v286_v32 }
 0x125   :  { %152 = vrot.lane.b32.xlu1 %v456_v39, %s541_s22 }
 0x126   :  { %312 = vmatpush.msra.mxu3 %v285_v33 }
 0x128   :  { %313 = vmatpush.msra.mxu3 %v284_v34 }
 0x12a   :  { %314 = vmatpush.msra.mxu3 %v283_v36 }
 0x12d   :  { %147 = vrot.lane.b32.xlu1 %v124_v40, %s539_s19 }
 0x135   :  { %180 = vrot.lane.b32.xlu1 %v457_v48, %s539_s19 }
 0x197   :  { %v153_v41 = vpop.permute.xlu1 %152 }
 0x198   :  { %v155_v42 = vmul.f32 %v153_v41, %v142_v37 }
 0x19a   :  { %157 = vrot.lane.b32.xlu2 %v155_v42, %s539_s19 }
 0x19f   :  { %v148_v43 = vpop.permute.xlu1 %147 }
 0x1a0   :  { %v150_v44 = vmul.f32 %v148_v43, %v142_v37  ;;  %v485_v43 = vld [vmem:[%s747_s5 + $0x2] ss:$0 sm:$0xff] }
 0x1a7   :  { %v181_v60 = vpop.permute.xlu1 %180 }
 0x1f4   :  { %v158_v45 = vpop.permute.xlu2 %157 }
 0x1f5   :  { %v620_v46 = vadd.f32 %v158_v45, %v150_v44 }
 0x1f7   :  { %491 = vtanh.f32 %v620_v46 }
 0x1fd   :  { %v492_v47 = vpop.eup %491 }
 0x1fe   :  { %163 = vrot.lane.b32.xlu2 %v492_v47, %s541_s22 }
 0x258   :  { %v164_v56 = vpop.permute.xlu2 %163 }
 0x259   :  { %v166_v57 = vmul.f32 %v164_v56, %v142_v37 }
 0x25b   :  { %168 = vrot.lane.b32.xlu0 %v166_v57, %s539_s19 }
 0x263   :  { %244 = vrot.lane.b32.xlu0 %v460_v59, %s539_s19 }
 0x2cd   :  { %v633_v61 = vpop.permute.xlu0 %168 }
 0x2ce   :  { %171 = vst.msk [vmem:[%s750_s8] sm:$0xff] %vm61_vm2, %v633_v61  ;;  %v183_v62 = vsel %vm61_vm2, %v633_v61, %v181_v60 }
 0x2cf   :  { %459 = vmatmul.msk.f32.vlgmr.msrb.gmra.mxu2 %vm71_vm3, %v183_v62 }
 0x2d5   :  { %v245_v20 = vpop.permute.xlu0 %244  ;;  %v465_v25 = vld [vmem:[%s744_s2 + $0x10] sm:$0xff] }
 0x352   :  { %v217_v0 = vpop.f32.mrf.mxu2 }
 0x353   :  { %v218_v1 = vadd.f32 %v484_v63, %v217_v0 }
 0x355   :  { %v461_v2 = vmul.f32 -1.442695, %v218_v1 }
 0x357   :  { %493 = vpow2.f32 %v461_v2 }
 0x35d   :  { %v494_v3 = vpop.eup %493 }
 0x35e   :  { %v225_v4 = vadd.f32 1.0, %v494_v3 }
 0x360   :  { %495 = vrcp.f32 %v225_v4  ;;  %v237_v8 = vand.u32 2147483648, %v225_v4  ;;  %v235_v10 = vand.u32 2147483647, %v225_v4  ;;  %vm231_vm9 = vweird.f32 %v225_v4 }
 0x362   :  { %v238_v12 = vor.u32 1.1754944e-38, %v237_v8  ;;  %vm236_vm11 = vcmp.eq.f32.partialorder %v235_v10, 8.507059e+37  ;;  %v390_v8 = vld [vmem:[%s748_s6 + $0x38] sm:$0xff]  ;;  %v388_v10 = vld [vmem:[%s748_s6 + $0x28] sm:$0xff] }
 0x366   :  { %v496_v5 = vpop.eup %495 }
 0x367   :  { %v227_v6 = vmul.f32 %v496_v5, %v225_v4  ;;  %vm232_vm8 = vweird.f32 %v496_v5 }
 0x368   :  { %vm233_vm10 = vmor %vm231_vm9, %vm232_vm8 }
 0x369   :  { %v228_v7 = vsub.f32 1.0, %v227_v6  ;;  %v393_v6 = vld [vmem:[%s748_s6 + $0x50] sm:$0xff] }
 0x36b   :  { %v229_v9 = vmul.f32 %v496_v5, %v228_v7  ;;  %v392_v7 = vld [vmem:[%s748_s6 + $0x48] sm:$0xff] }
 0x36d   :  { %v230_v11 = vadd.f32 %v496_v5, %v229_v9  ;;  %v389_v9 = vld [vmem:[%s748_s6 + $0x30] sm:$0xff] }
 0x36f   :  { %v234_v13 = vsel %vm233_vm10, %v496_v5, %v230_v11  ;;  %v394_v5 = vld [vmem:[%s748_s6 + $0x58] sm:$0xff]  ;;  %v387_v11 = vld [vmem:[%s748_s6 + $0x20] sm:$0xff] }
 0x370   :  { %v239_v14 = vsel %vm236_vm11, %v238_v12, %v234_v13  ;;  %405 = vmatpush.msra.mxu1 %v394_v5  ;;  %v386_v12 = vld [vmem:[%s748_s6 + $0x18] sm:$0xff] }
 0x371   :  { %v241_v16 = vmul.f32 2.0, %v239_v14  ;;  %v247_v21 = vmul.f32 %v245_v20, %v239_v14  ;;  %v383_v20 = vld [vmem:[%s748_s6] sm:$0xff] }
 0x372   :  { %406 = vmatpush.msra.mxu1 %v393_v6 }
 0x373   :  { %v462_v17 = vadd.f32 -1.0, %v241_v16  ;;  %v385_v16 = vld [vmem:[%s748_s6 + $0x10] sm:$0xff] }
 0x374   :  { %407 = vmatpush.msra.mxu1 %v392_v7 }
 0x375   :  { %249 = vrot.lane.b32.xlu2 %v462_v17, %s541_s22  ;;  %v384_v17 = vld [vmem:[%s748_s6 + $0x8] sm:$0xff] }
 0x3cf   :  { %v250_v18 = vpop.permute.xlu2 %249 }
 0x3d0   :  { %v252_v19 = vmul.f32 %v250_v18, %v239_v14 }
 0x3d2   :  { %254 = vrot.lane.b32.xlu1 %v252_v19, %s539_s19 }
 0x3da   :  { %279 = vrot.lane.b32.xlu1 %v465_v25, %s539_s19  ;;  %v486_v25 = vld [vmem:[%s748_s6 + $0x60] ss:$0 sm:$0xff] }
 0x444   :  { %v255_v22 = vpop.permute.xlu1 %254 }
 0x445   :  { %v257_v23 = vadd.f32 %v255_v22, %v247_v21 }
 0x447   :  { %497 = vtanh.f32 %v257_v23 }
 0x44c   :  { %v280_v37 = vpop.permute.xlu1 %279 }
 0x44d   :  { %v498_v24 = vpop.eup %497 }
 0x44e   :  { %260 = vrot.lane.b32.xlu2 %v498_v24, %s541_s22 }
 0x4a8   :  { %v261_v30 = vpop.permute.xlu2 %260 }
 0x4a9   :  { %v263_v31 = vmul.f32 %v261_v30, %v239_v14 }
 0x4ab   :  { %265 = vrot.lane.b32.xlu0 %v263_v31, %s539_s19 }
 0x4b3   :  { %343 = vrot.lane.b32.xlu0 %v468_v35, %s539_s19 }
 0x4bb   :  { %375 = vrot.lane.b32.xlu0 %v263_v31, %s541_s22 }
 0x4c3   :  { %271 = vrot.lane.b32.xlu0 %v257_v23, %s542_s15 }
 0x51d   :  { %v266_v38 = vpop.permute.xlu0 %265 }
 0x51e   :  { %463 = vst.msk [vmem:[%s750_s8 + $0x8] sm:$0xff] %vm61_vm2, %v266_v38  ;;  %v282_v39 = vsel %vm61_vm2, %v266_v38, %v280_v37 }
 0x51f   :  { %467 = vmatmul.msk.f32.vlgmr.msra.gmra.mxu3 %vm71_vm3, %v282_v39 }
 0x525   :  { %v344_v40 = vpop.permute.xlu0 %343 }
 0x52d   :  { %v666_v41 = vpop.permute.xlu0 %375 }
 0x52e   :  { %v381_v21 = vsel %vm61_vm2, %v633_v61, %v666_v41 }
 0x535   :  { %v272_v42 = vpop.permute.xlu0 %271 }
 0x536   :  { %464 = vst.msk [vmem:[%s751_s9 + $0x8] sm:$0xff] %vm61_vm2, %v272_v42 }
 0x5a2   :  { %v316_v44 = vpop.f32.mrf.mxu3 }
 0x5a3   :  { %v317_v45 = vadd.f32 %v485_v43, %v316_v44 }
 0x5a5   :  { %v469_v47 = vmul.f32 -1.442695, %v317_v45 }
 0x5a7   :  { %499 = vpow2.f32 %v469_v47 }
 0x5ad   :  { %v500_v48 = vpop.eup %499 }
 0x5ae   :  { %v324_v49 = vadd.f32 1.0, %v500_v48 }
 0x5b0   :  { %501 = vrcp.f32 %v324_v49  ;;  %v336_v53 = vand.u32 2147483648, %v324_v49  ;;  %v334_v55 = vand.u32 2147483647, %v324_v49  ;;  %vm330_vm13 = vweird.f32 %v324_v49 }
 0x5b2   :  { %v337_v57 = vor.u32 1.1754944e-38, %v336_v53  ;;  %vm335_vm15 = vcmp.eq.f32.partialorder %v334_v55, 8.507059e+37 }
 0x5b6   :  { %v502_v50 = vpop.eup %501 }
 0x5b7   :  { %v326_v51 = vmul.f32 %v502_v50, %v324_v49  ;;  %vm331_vm12 = vweird.f32 %v502_v50 }
 0x5b8   :  { %vm332_vm14 = vmor %vm330_vm13, %vm331_vm12 }
 0x5b9   :  { %v327_v52 = vsub.f32 1.0, %v326_v51 }
 0x5bb   :  { %v328_v54 = vmul.f32 %v502_v50, %v327_v52 }
 0x5bd   :  { %v329_v56 = vadd.f32 %v502_v50, %v328_v54 }
 0x5bf   :  { %v333_v58 = vsel %vm332_vm14, %v502_v50, %v329_v56 }
 0x5c0   :  { %v338_v59 = vsel %vm335_vm15, %v337_v57, %v333_v58 }
 0x5c1   :  { %v340_v60 = vmul.f32 2.0, %v338_v59  ;;  %v346_v1 = vmul.f32 %v344_v40, %v338_v59 }
 0x5c3   :  { %v470_v62 = vadd.f32 -1.0, %v340_v60 }
 0x5c5   :  { %348 = vrot.lane.b32.xlu2 %v470_v62, %s541_s22 }
 0x61f   :  { %v349_v63 = vpop.permute.xlu2 %348 }
 0x620   :  { %v351_v0 = vmul.f32 %v349_v63, %v338_v59 }
 0x622   :  { %353 = vrot.lane.b32.xlu1 %v351_v0, %s539_s19 }
 0x694   :  { %v354_v2 = vpop.permute.xlu1 %353 }
 0x695   :  { %v356_v3 = vadd.f32 %v354_v2, %v346_v1 }
 0x697   :  { %503 = vtanh.f32 %v356_v3 }
 0x69d   :  { %v504_v4 = vpop.eup %503 }
 0x69e   :  { %359 = vrot.lane.b32.xlu2 %v504_v4, %s541_s22 }
 0x6a6   :  { %173 = vrot.lane.b32.xlu2 %v620_v46, %s542_s15  ;;  %v391_v46 = vld [vmem:[%s748_s6 + $0x40] sm:$0xff] }
 0x6a7   :  { %408 = vmatpush.msra.mxu1 %v391_v46 }
 0x6a9   :  { %409 = vmatpush.msra.mxu1 %v390_v8 }
 0x6ab   :  { %410 = vmatpush.msra.mxu1 %v389_v9 }
 0x6ad   :  { %411 = vmatpush.msra.mxu1 %v388_v10 }
 0x6ae   :  { %370 = vrot.lane.b32.xlu2 %v356_v3, %s542_s15 }
 0x6af   :  { %412 = vmatpush.msra.mxu1 %v387_v11 }
 0x6b1   :  { %413 = vmatpush.msra.mxu1 %v386_v12 }
 0x6b3   :  { %414 = vmatpush.msra.mxu1 %v385_v16 }
 0x6b5   :  { %415 = vmatpush.msra.mxu1 %v384_v17 }
 0x6b7   :  { %416 = vmatpush.msra.mxu1 %v383_v20 }
 0x6f8   :  { %v360_v13 = vpop.permute.xlu2 %359 }
 0x6f9   :  { %v362_v14 = vmul.f32 %v360_v13, %v338_v59 }
 0x6fb   :  { %378 = vrot.lane.b32.xlu1 %v362_v14, %s542_s15 }
 0x700   :  { %v174_v18 = vpop.permute.xlu2 %173 }
 0x701   :  { %176 = vst.msk [vmem:[%s751_s9] sm:$0xff] %vm61_vm2, %v174_v18 }
 0x703   :  { %364 = vrot.lane.b32.xlu1 %v362_v14, %s539_s19 }
 0x708   :  { %v371_v19 = vpop.permute.xlu2 %370 }
 0x709   :  { %472 = vst.msk [vmem:[%s751_s9 + $0x10] sm:$0xff] %vm61_vm2, %v371_v19 }
 0x76d   :  { %v379_v22 = vpop.permute.xlu1 %378 }
 0x76e   :  { %v382_v23 = vsel %vm71_vm3, %v381_v21, %v379_v22 }
 0x76f   :  { %473 = vmatmul.msk.f32.vlgmr.msra.gmra.mxu1 %vm397_vm0, %v382_v23 }
 0x775   :  { %v365_v24 = vpop.permute.xlu1 %364 }
 0x776   :  { %471 = vst.msk [vmem:[%s750_s8 + $0x10] sm:$0xff] %vm61_vm2, %v365_v24 }
 0x7ec   :  { %v418_v26 = vpop.f32.mrf.mxu1 }
 0x7ed   :  { %v419_v27 = vadd.f32 %v486_v25, %v418_v26 }
 0x7ef   :  { %v423_v28 = vmin.f32 %v419_v27, 20.0  ;;  %vm422_vm3 = vcmp.gt.f32.partialorder %v419_v27, 20.0 }
 0x7f1   :  { %v424_v29 = vmul.f32 1.442695, %v423_v28 }
 0x7f3   :  { %505 = vpow2.f32 %v424_v29 }
 0x7f9   :  { %v506_v61 = vpop.eup %505 }
 0x7fa   :  { %v426_v30 = vadd.f32 1.0, %v506_v61  ;;  %v429_v31 = vmul.f32 -0.5, %v506_v61  ;;  %v432_v33 = vand.u32 2147483647, %v506_v61 }
 0x7fc   :  { %507 = vlog2.f32 %v426_v30  ;;  %v430_v32 = vadd.f32 1.0, %v429_v31  ;;  %vm433_vm2 = vcmp.lt.f32.partialorder %v432_v33, 0.0004427343 }
 0x7fe   :  { %v431_v36 = vmul.f32 %v506_v61, %v430_v32 }
 0x802   :  { %v508_v34 = vpop.eup %507 }
 0x803   :  { %v428_v35 = vmul.f32 0.6931472, %v508_v34 }
 0x805   :  { %v434_v37 = vsel %vm433_vm2, %v431_v36, %v428_v35 }
 0x806   :  { %v435_v38 = vsel %vm422_vm3, %v419_v27, %v434_v37 }
 0x807   :  { %v436_v39 = vsel %vm421_vm1, %v419_v27, %v435_v38 }
 0x808   :  { %438 = vst.msk [vmem:[%s749_s7] sm:$0xff] %vm437_vm4, %v436_v39 }
 0x809   :  { %451 = vsyncpa [#allocation3], 1 }

</bundles_post_ra>
